<compile_context>
chip_gen: v6e
topology: v6e:2x2x1
jax: 0.10.0
libtpu: 0.0.40
codegen_flags: <defaults>
</compile_context>

<pallas_src>
import functools
import math

import jax
import jax.numpy as jnp
from jax.experimental import pallas as pl
from jax.experimental.pallas import tpu as pltpu


_MAX_UNROLL_SEGMENTS = 64               # above this, fall back to row-flat GEMM path
_TARGET_BLOCK_BYTES = 4 * 1024 * 1024   # per-step (in+out) block budget; x2 for double buffering
_VMEM_LIMIT_BYTES = 32 * 1024 * 1024    # safe scoped limit on v5e / v6e / v7x


def _pick_tile_rows(rows, lanes_in, lanes_out, dtype_bytes=4):
    """Largest row tile (multiple of 8, <=1024) whose in+out blocks fit the budget."""
    per_row = (lanes_in + lanes_out) * dtype_bytes
    tile = _TARGET_BLOCK_BYTES // max(per_row, 1)
    tile = max(8, min(1024, tile))
    tile = (tile // 8) * 8
    return rows if rows <= tile else tile


def _compiler_params():
    return pltpu.CompilerParams(
        dimension_semantics=("parallel",),
        vmem_limit_bytes=_VMEM_LIMIT_BYTES)


# ----------------------------------------------------------------------------
# Kernels
# ----------------------------------------------------------------------------
def _pad_left_kernel(x_ref, o_ref, *, pad_len):
    """Left-pad each row with `pad_len` zeros; one unmasked full-tile store."""
    x = x_ref[...]
    if pad_len == 0:
        o_ref[...] = x
    else:
        zeros = jnp.zeros((x.shape[0], pad_len), dtype=x.dtype)
        o_ref[...] = jnp.concatenate([zeros, x], axis=-1)


def _seg_linear_kernel(x_ref, w_ref, b_ref, o_ref, *, pad_len, n_seg, d_in):
    """Per row tile: (implicit left-pad) -> segment -> seg @ W + b, lane-dense store.

    x_ref: (tile_r, n_seg*d_in - pad_len)   raw rows (lane axis = time/features)
    w_ref: (d_in, d_out)                    pre-transposed weight (stays VMEM-resident)
    b_ref: (1, d_out)
    o_ref: (tile_r, n_seg*d_out)            segments packed along lanes
    """
    x = x_ref[...]
    w = w_ref[...]
    b = b_ref[...]
    parts = []
    for n in range(n_seg):
        lo = n * d_in - pad_len
        if lo < 0:
            # First segment: the leading `pad_len` zeros contribute nothing to the
            # contraction, so use the visible tail of the segment against the
            # matching tail rows of the weight (no pad materialized at all).
            p = jnp.dot(x[:, : d_in - pad_len], w[pad_len:, :],
                        preferred_element_type=jnp.float32)
        else:
            p = jnp.dot(x[:, lo: lo + d_in], w,
                        preferred_element_type=jnp.float32)
        parts.append(p + b)
    y = parts[0] if n_seg == 1 else jnp.concatenate(parts, axis=-1)
    o_ref[...] = y.astype(o_ref.dtype)


def _rowwise_linear_kernel(x_ref, w_ref, b_ref, o_ref):
    """Plain row-tiled GEMM fallback (used only for very large segment counts)."""
    acc = jnp.dot(x_ref[...], w_ref[...], preferred_element_type=jnp.float32)
    o_ref[...] = (acc + b_ref[...]).astype(o_ref.dtype)


# ----------------------------------------------------------------------------
# pallas_call wrappers
# ----------------------------------------------------------------------------
def _seg_linear_call(x2d, w, b, *, pad_len, n_seg):
    rows, lanes_in = x2d.shape
    d_in, d_out = w.shape
    lanes_out = n_seg * d_out
    assert lanes_in == n_seg * d_in - pad_len

    tile_r = _pick_tile_rows(rows, lanes_in, lanes_out)
    grid = (pl.cdiv(rows, tile_r),)
    kernel = functools.partial(_seg_linear_kernel, pad_len=pad_len,
                               n_seg=n_seg, d_in=d_in)
    cost = pl.CostEstimate(
        flops=2 * rows * n_seg * d_in * d_out,
        transcendentals=0,
        bytes_accessed=4 * (rows * (lanes_in + lanes_out) + d_in * d_out + d_out))

    return pl.pallas_call(
        kernel,
        out_shape=jax.ShapeDtypeStruct((rows, lanes_out), x2d.dtype),
        grid=grid,
        in_specs=[
            pl.BlockSpec((tile_r, lanes_in), lambda i: (i, 0)),
            pl.BlockSpec((d_in, d_out), lambda i: (0, 0)),   # weight stays resident
            pl.BlockSpec((1, d_out), lambda i: (0, 0)),
        ],
        out_specs=pl.BlockSpec((tile_r, lanes_out), lambda i: (i, 0)),
        compiler_params=_compiler_params(),
        cost_estimate=cost,
    )(x2d, w, b.reshape(1, d_out))


def _rowwise_linear_call(x2d, w, b):
    rows, d_in = x2d.shape
    d_out = w.shape[1]
    tile_r = _pick_tile_rows(rows, d_in, d_out)
    grid = (pl.cdiv(rows, tile_r),)
    cost = pl.CostEstimate(
        flops=2 * rows * d_in * d_out,
        transcendentals=0,
        bytes_accessed=4 * (rows * (d_in + d_out) + d_in * d_out + d_out))

    return pl.pallas_call(
        _rowwise_linear_kernel,
        out_shape=jax.ShapeDtypeStruct((rows, d_out), x2d.dtype),
        grid=grid,
        in_specs=[
            pl.BlockSpec((tile_r, d_in), lambda i: (i, 0)),
            pl.BlockSpec((d_in, d_out), lambda i: (0, 0)),
            pl.BlockSpec((1, d_out), lambda i: (0, 0)),
        ],
        out_specs=pl.BlockSpec((tile_r, d_out), lambda i: (i, 0)),
        compiler_params=_compiler_params(),
        cost_estimate=cost,
    )(x2d, w, b.reshape(1, d_out))


# ----------------------------------------------------------------------------
# Public ops (mirror the PyTorch module)
# ----------------------------------------------------------------------------
def segment_forward(x, s):
    """SegmentTokenizer.forward: (B, C, L) -> (B, C, N, s), left-padded with zeros."""
    B, C, L = x.shape
    pad_len = (s - L % s) % s
    L_padded = L + pad_len
    N = L_padded // s
    rows = B * C
    x2d = x.reshape(rows, L)

    tile_r = _pick_tile_rows(rows, L, L_padded)
    grid = (pl.cdiv(rows, tile_r),)
    kernel = functools.partial(_pad_left_kernel, pad_len=pad_len)

    padded = pl.pallas_call(
        kernel,
        out_shape=jax.ShapeDtypeStruct((rows, L_padded), x.dtype),
        grid=grid,
        in_specs=[pl.BlockSpec((tile_r, L), lambda i: (i, 0))],
        out_specs=pl.BlockSpec((tile_r, L_padded), lambda i: (i, 0)),
        compiler_params=_compiler_params(),
        cost_estimate=pl.CostEstimate(
            flops=0, transcendentals=0,
            bytes_accessed=4 * rows * (L + L_padded)),
    )(x2d)
    return padded.reshape(B, C, N, s)


def segmented_linear(x, w, b):
    """x: (..., N, d_in), w: (d_in, d_out) pre-transposed, b: (d_out,)."""
    *lead, N, d_in = x.shape
    rows = math.prod(lead) if lead else 1
    d_out = w.shape[1]
    if N <= _MAX_UNROLL_SEGMENTS:
        # lane-dense formulation: pack all N segments of a row along lanes
        out = _seg_linear_call(x.reshape(rows, N * d_in), w, b, pad_len=0, n_seg=N)
        return out.reshape(*lead, N, d_out)
    # Very large N: avoid a huge unrolled kernel; plain row-tiled GEMM instead.
    out = _rowwise_linear_call(x.reshape(rows * N, d_in), w, b)
    return out.reshape(*lead, N, d_out)


def fused_pad_tokenize(x, s, w_tok, b_tok):
    """Fused forward + tokenize: (B, C, L) -> (B, C, N, d_model), single HBM pass over x."""
    B, C, L = x.shape
    pad_len = (s - L % s) % s
    N = (L + pad_len) // s
    d_model = w_tok.shape[1]
    if N > _MAX_UNROLL_SEGMENTS:
        # TODO(synk): for very long sequences, tile the segment axis in-kernel instead
        # of falling back to the two-pass (pad kernel + linear kernel) path.
        return segmented_linear(segment_forward(x, s), w_tok, b_tok)
    out2d = _seg_linear_call(x.reshape(B * C, L), w_tok, b_tok,
                             pad_len=pad_len, n_seg=N)
    return out2d.reshape(B, C, N, d_model)


# ----------------------------------------------------------------------------
# SegmentTokenizer in JAX
# ----------------------------------------------------------------------------
class SegmentTokenizerPallas:
    def __init__(self, s, d_model, key):
        self.s = s
        self.d_model = d_model
        k1, k2, k3, k4 = jax.random.split(key, 4)
        # nn.Linear-style init U(-1/sqrt(in), 1/sqrt(in)); weights stored PRE-TRANSPOSED
        # as (d_in, d_out) so no wrapper-side transpose is ever needed.
        bound_in = 1.0 / math.sqrt(s)
        self.w_tok = jax.random.uniform(k1, (s, d_model), jnp.float32, -bound_in, bound_in)
        self.b_tok = jax.random.uniform(k2, (d_model,), jnp.float32, -bound_in, bound_in)
        bound_out = 1.0 / math.sqrt(d_model)
        self.w_out = jax.random.uniform(k3, (d_model, s), jnp.float32, -bound_out, bound_out)
        self.b_out = jax.random.uniform(k4, (s,), jnp.float32, -bound_out, bound_out)

    def forward(self, x):                 # (B, C, L) -> (B, C, N, s)
        return segment_forward(x, self.s)

    def tokenize(self, x_segmented):      # (B, C, N, s) -> (B, C, N, d_model)
        return segmented_linear(x_segmented, self.w_tok, self.b_tok)

    def inverse_tokenize(self, x):        # (B, C, N, d_model) -> (B, C, N, s)
        return segmented_linear(x, self.w_out, self.b_out)

    def forward_tokenize(self, x):        # fused hot path: (B, C, L) -> (B, C, N, d_model)
        return fused_pad_tokenize(x, self.s, self.w_tok, self.b_tok)


if __name__ == "__main__":
    key = jax.random.PRNGKey(0)
    k_x, k_params = jax.random.split(key)

    B, C, L = 2, 4, 13        # L not a multiple of s -> exercises the padding path
    s, d_model = 8, 32

    x = jax.random.normal(k_x, (B, C, L), jnp.float32)
    model = SegmentTokenizerPallas(s, d_model, k_params)

    # forward: pad + segment
    x_seg = jax.block_until_ready(model.forward(x))
    pad_len = (s - L % s) % s
    ref_seg = jnp.pad(x, ((0, 0), (0, 0), (pad_len, 0))).reshape(B, C, -1, s)
    assert x_seg.shape == ref_seg.shape
    assert jnp.allclose(x_seg, ref_seg, atol=1e-6)

    # fused forward + tokenize (hot path: single HBM pass over x)
    tok_fused = jax.block_until_ready(model.forward_tokenize(x))
    ref_tok = jnp.einsum('bcns,sm->bcnm', ref_seg, model.w_tok) + model.b_tok
    assert tok_fused.shape == (B, C, ref_seg.shape[2], d_model)
    assert jnp.allclose(tok_fused, ref_tok, atol=1e-5)

    # unfused tokenize (spec parity with the PyTorch module)
    tok = jax.block_until_ready(model.tokenize(x_seg))
    assert jnp.allclose(tok, ref_tok, atol=1e-5)

    # inverse_tokenize
    inv = jax.block_until_ready(model.inverse_tokenize(tok))
    ref_inv = jnp.einsum('bcnm,ms->bcns', tok, model.w_out) + model.b_out
    assert inv.shape == (B, C, ref_seg.shape[2], s)
    assert jnp.allclose(inv, ref_inv, atol=1e-5)

    print("KERNEL_OK")
</pallas_src>

<mosaic_0001>
module attributes {stable_mosaic.version = 11 : i64} {
  func.func @_pad_left_kernel(%arg0: i32, %arg1: memref<8x13xf32, #tpu.memory_space<vmem>>, %arg2: memref<8x16xf32, #tpu.memory_space<vmem>>) attributes {dimension_semantics = [#tpu.dimension_semantics<parallel>], iteration_bounds = array<i64: 1>, scalar_prefetch = 0 : i64, scratch_operands = 0 : i64, tpu.core_type = #tpu.core_type<tc>, window_params = [{transform_indices = @transform_0, window_bounds = array<i64: 8, 13>}, {transform_indices = @transform_1, window_bounds = array<i64: 8, 16>}]} {
    %c0 = arith.constant 0 : index
    %c0_0 = arith.constant 0 : index
    %0 = vector.load %arg1[%c0, %c0_0] : memref<8x13xf32, #tpu.memory_space<vmem>>, vector<8x13xf32>
    %cst = arith.constant 0.000000e+00 : f32
    %1 = vector.broadcast %cst : f32 to vector<8x3xf32>
    %2 = tpu.concatenate %1, %0 in 1 : vector<8x3xf32>, vector<8x13xf32> -> vector<8x16xf32>
    %c0_1 = arith.constant 0 : index
    %c0_2 = arith.constant 0 : index
    %3 = vector.load %arg2[%c0_1, %c0_2] : memref<8x16xf32, #tpu.memory_space<vmem>>, vector<8x16xf32>
    tpu.vector_store %arg2[%c0_1, %c0_2], %2 {strides = array<i32>} : memref<8x16xf32, #tpu.memory_space<vmem>>, vector<8x16xf32>,
    return
  }
  func.func @transform_0(%arg0: i32) -> (i32, i32) {
    %c0_i32 = arith.constant 0 : i32
    %c0_i32_0 = arith.constant 0 : i32
    return %arg0, %c0_i32 : i32, i32
  }
  func.func @transform_1(%arg0: i32) -> (i32, i32) {
    %c0_i32 = arith.constant 0 : i32
    %c0_i32_0 = arith.constant 0 : i32
    return %arg0, %c0_i32 : i32, i32
  }
}

</mosaic_0001>

<bundles_post_ra>
// kernel: tpu_custom_call.1
= control target key start
LH: loop header
LB: loop body
LE: loop exit
PB: predicated region body
PF: predicated region fallthrough
CT: control target
= control target key end

     0   :  { %6 = vsyncpa [#allocation3], 0  ;;  %s111_s0 = inlined_call_operand.hbm [shape: f32[8,13], index: 0, kind: input, shape index: {}]   ;;  %s112_s1 = inlined_call_operand.hbm [shape: f32[8,16], index: 1, kind: output, shape index: {}]  }
   0x1   :  { %7 = vsyncpa [#allocation4], 0  ;;  %s92_s6 = smov [#allocation2]  }
   0x2   :  { %s14_s7 = sshll.u32 %s92_s6, 4  ;;  %s15_s7 = int_to_ptr.vmem [resolvable:$true] %s14_s7 }
   0x3   :  { %s56_s8 = scalar_lea.vmem %s15_s7, 128  ;;  %p61_p1 = scmp.lt.s32.totalorder %s15_s7, %s15_s7 }
   0x4   :  { %p57_p0 = scmp.ne.s32.totalorder %s15_s7, %s56_s8  ;;  %p62_p2 = scmp.lt.s32.totalorder %s56_s8, %s56_s8 }
   0x6   :  { %p63_p3 = por %p62_p2, %p61_p1 }
   0x8   :  { %p64_p4 = pnand %p63_p3, %p57_p0 }
   0xa   :  { %67 = shalt.err (!%p64_p4)
}
   0xb   :  { %17 = dma.hbm_to_vmem [thread:$0]  %s111_s0, 128, %s15_s7, [#allocation3]  }
   0xc   :  { %88 = dma.done.wait [#allocation3], 128  }
   0xd   :  { %89 = vsyncadd [#allocation3], 4294967168  ;;  %v21_v0 = vld [vmem:[#allocation2] sm:$0xff]  ;;  %s93_s11 = smov 3   ;;  %s94_s12 = smov [#allocation5]   ;;  %vm26_vm0 = vcmask 23552  }
   0xe   :  { %23 = vrot.lane.b32.xlu0 %v21_v0, %s93_s11  ;;  %s36_s13 = sshll.u32 %s94_s12, 4  ;;  %vm28_vm1 = vcmask 130048   ;;  %s37_s13 = int_to_ptr.vmem [resolvable:$true] %s36_s13 }
   0xf   :  { %s68_s14 = scalar_lea.vmem %s37_s13, 128  ;;  %p73_p6 = scmp.lt.s32.totalorder %s37_s13, %s37_s13 }
  0x10   :  { %p69_p5 = scmp.ne.s32.totalorder %s37_s13, %s68_s14  ;;  %p74_p7 = scmp.lt.s32.totalorder %s68_s14, %s68_s14 }
  0x12   :  { %p75_p8 = por %p74_p7, %p73_p6 }
  0x14   :  { %p76_p9 = pnand %p75_p8, %p69_p5 }
  0x80   :  { %v24_v1 = vpop.permute.xlu0 %23 }
  0x81   :  { %v27_v2 = vsel %vm26_vm0, 0.0, %v24_v1 }
  0x82   :  { %29 = vst.msk [vmem:[#allocation5] sm:$0xff] %vm28_vm1, %v27_v2 }
  0x83   :  { %79 = shalt.err (!%p76_p9)
}
  0x84   :  { %39 = dma.vmem_to_hbm [thread:$0]  %s37_s13, 128, %s112_s1, [#allocation4]  }
  0x85   :  { %90 = dma.done.wait [#allocation4], 128  }
  0x86   :  { %91 = vsyncadd [#allocation4], 4294967168 }
  0x87   :  { %43 = vsyncpa [#allocation3], 1 }
  0x88   :  { %44 = vsyncpa [#allocation4], 1 }

</bundles_post_ra>
